<compile_context>
chip_gen: v5e
topology: v5e:2x2
jax: 0.10.0
libtpu: 0.0.40
codegen_flags: <defaults>
</compile_context>

<pallas_src>
import jax
import jax.numpy as jnp
from jax.experimental import pallas as pl
from jax.experimental.pallas import tpu as pltpu


def _normalize_kernel(x_ref, scale_ref, shift_ref, o_ref):
    # x_ref / o_ref: VMEM (R, Bc) tile of the flattened (N*C, H*W) image.
    # scale_ref / shift_ref: VMEM (R, 1) per-row scale / shift (VPU broadcast).
    o_ref[...] = x_ref[...] * scale_ref[...] + shift_ref[...]


def _choose_blocks(rows, cols, itemsize, target_bytes=4 * 1024 * 1024):
    """Pick a lane-dense (row_block, col_block) of roughly `target_bytes`."""
    # Column block: keep full width unless a single 8-row stripe would blow the
    # budget AND the width tiles cleanly into 128-lane chunks.
    if cols % 128 != 0 or 8 * cols * itemsize <= target_bytes:
        bc = cols
    else:
        bc = (target_bytes // (8 * itemsize)) // 128 * 128
        bc = int(min(max(bc, 128), cols))
    # Row block: full height if it fits, otherwise the largest multiple of 8
    # that keeps the block near the target size.
    if rows * bc * itemsize <= target_bytes:
        br = rows
    else:
        br = (target_bytes // (bc * itemsize)) // 8 * 8
        br = int(min(max(br, 8), rows))
    return br, bc


def normalize(x, mean, std):
    """x: (N, C, H, W); mean/std: (C,) per-channel parameters."""
    N, C, H, W = x.shape
    rows, cols = N * C, H * W
    dtype = x.dtype
    itemsize = jnp.dtype(dtype).itemsize

    mean = jnp.asarray(mean, dtype=dtype)
    std = jnp.asarray(std, dtype=dtype)

    # Flatten to a lane-dense 2D view; expand per-channel params to per-row
    # fused scale/shift columns (tiny arrays, built once outside the kernel).
    x2d = x.reshape(rows, cols)
    inv_std = 1.0 / std
    scale_rows = jnp.broadcast_to(inv_std[None, :], (N, C)).reshape(rows, 1)
    shift_rows = jnp.broadcast_to((-mean * inv_std)[None, :], (N, C)).reshape(rows, 1)

    br, bc = _choose_blocks(rows, cols, itemsize)
    grid = (pl.cdiv(rows, br), pl.cdiv(cols, bc))

    grid_spec = pl.GridSpec(
        grid=grid,
        in_specs=[
            pl.BlockSpec((br, bc), lambda i, j: (i, j)),
            pl.BlockSpec((br, 1), lambda i, j: (i, 0)),
            pl.BlockSpec((br, 1), lambda i, j: (i, 0)),
        ],
        out_specs=pl.BlockSpec((br, bc), lambda i, j: (i, j)),
    )

    out2d = pl.pallas_call(
        _normalize_kernel,
        out_shape=jax.ShapeDtypeStruct((rows, cols), dtype),
        grid_spec=grid_spec,
        compiler_params=pltpu.CompilerParams(
            dimension_semantics=("parallel", "parallel"),
        ),
        cost_estimate=pl.CostEstimate(
            flops=2 * rows * cols,
            transcendentals=0,
            bytes_accessed=2 * rows * cols * itemsize,
        ),
    )(x2d, scale_rows, shift_rows)

    return out2d.reshape(N, C, H, W)


if __name__ == "__main__":
    key = jax.random.PRNGKey(0)
    N, C, H, W = 2, 4, 16, 16
    x = jax.random.normal(key, (N, C, H, W), dtype=jnp.float32)

    # Deterministic per-channel normalization parameters (shape (C,)).
    mean = jnp.array([0.485, 0.456, 0.406, 0.5], dtype=jnp.float32)
    std = jnp.array([0.229, 0.224, 0.225, 0.25], dtype=jnp.float32)

    out = normalize(x, mean, std)
    out = jax.block_until_ready(out)

    # Reference check (plain JAX broadcast).
    ref = (x - mean[None, :, None, None]) / std[None, :, None, None]
    assert jnp.allclose(out, ref, atol=1e-5, rtol=1e-5)

    print("KERNEL_OK")
</pallas_src>

<mosaic_0001>
module attributes {stable_mosaic.version = 11 : i64} {
  func.func @_normalize_kernel(%arg0: i32, %arg1: i32, %arg2: memref<8x256xf32, #tpu.memory_space<vmem>>, %arg3: memref<8x1xf32, #tpu.memory_space<vmem>>, %arg4: memref<8x1xf32, #tpu.memory_space<vmem>>, %arg5: memref<8x256xf32, #tpu.memory_space<vmem>>) attributes {dimension_semantics = [#tpu.dimension_semantics<parallel>, #tpu.dimension_semantics<parallel>], iteration_bounds = array<i64: 1, 1>, scalar_prefetch = 0 : i64, scratch_operands = 0 : i64, tpu.core_type = #tpu.core_type<tc>, window_params = [{transform_indices = @transform_0, window_bounds = array<i64: 8, 256>}, {transform_indices = @transform_1, window_bounds = array<i64: 8, 1>}, {transform_indices = @transform_2, window_bounds = array<i64: 8, 1>}, {transform_indices = @transform_3, window_bounds = array<i64: 8, 256>}]} {
    %c0 = arith.constant 0 : index
    %c0_0 = arith.constant 0 : index
    %0 = vector.load %arg2[%c0, %c0_0] : memref<8x256xf32, #tpu.memory_space<vmem>>, vector<8x256xf32>
    %c0_1 = arith.constant 0 : index
    %c0_2 = arith.constant 0 : index
    %1 = vector.load %arg3[%c0_1, %c0_2] : memref<8x1xf32, #tpu.memory_space<vmem>>, vector<8x1xf32>
    %2 = vector.broadcast %1 : vector<8x1xf32> to vector<8x256xf32>
    %3 = arith.mulf %0, %2 : vector<8x256xf32>
    %c0_3 = arith.constant 0 : index
    %c0_4 = arith.constant 0 : index
    %4 = vector.load %arg4[%c0_3, %c0_4] : memref<8x1xf32, #tpu.memory_space<vmem>>, vector<8x1xf32>
    %5 = vector.broadcast %4 : vector<8x1xf32> to vector<8x256xf32>
    %6 = arith.addf %3, %5 : vector<8x256xf32>
    %c0_5 = arith.constant 0 : index
    %c0_6 = arith.constant 0 : index
    %7 = vector.load %arg5[%c0_5, %c0_6] : memref<8x256xf32, #tpu.memory_space<vmem>>, vector<8x256xf32>
    tpu.vector_store %arg5[%c0_5, %c0_6], %6 {strides = array<i32>} : memref<8x256xf32, #tpu.memory_space<vmem>>, vector<8x256xf32>,
    return
  }
  func.func @transform_0(%arg0: i32, %arg1: i32) -> (i32, i32) {
    %c0_i32 = arith.constant 0 : i32
    return %arg0, %arg1 : i32, i32
  }
  func.func @transform_1(%arg0: i32, %arg1: i32) -> (i32, i32) {
    %c0_i32 = arith.constant 0 : i32
    %c0_i32_0 = arith.constant 0 : i32
    return %arg0, %c0_i32 : i32, i32
  }
  func.func @transform_2(%arg0: i32, %arg1: i32) -> (i32, i32) {
    %c0_i32 = arith.constant 0 : i32
    %c0_i32_0 = arith.constant 0 : i32
    return %arg0, %c0_i32 : i32, i32
  }
  func.func @transform_3(%arg0: i32, %arg1: i32) -> (i32, i32) {
    %c0_i32 = arith.constant 0 : i32
    return %arg0, %arg1 : i32, i32
  }
}

</mosaic_0001>

<bundles_post_ra>
// kernel: tpu_custom_call.1
= control target key start
LH: loop header
LB: loop body
LE: loop exit
PB: predicated region body
PF: predicated region fallthrough
CT: control target
= control target key end

     0   :  { %s117_s0 = inlined_call_operand.vmem [shape: f32[8,256], index: 0, kind: input, shape index: {}]   ;;  %s118_s1 = inlined_call_operand.vmem [shape: f32[8,1], index: 1, kind: input, shape index: {}]   ;;  %s119_s2 = inlined_call_operand.vmem [shape: f32[8,1], index: 2, kind: input, shape index: {}]   ;;  %s120_s3 = inlined_call_operand.hbm [shape: f32[8,256], index: 3, kind: output, shape index: {}]  }
   0x1   :  { %v17_v0 = vld [vmem:[%s118_s1] sm:$0xff] }
   0x2   :  { %8 = vsyncpa [#allocation3], 0  ;;  %v80_v1 = vmov 0   ;;  %v25_v2 = vld [vmem:[%s119_s2] sm:$0xff]  ;;  %v16_v5 = vld [vmem:[%s117_s0 + $0x8] sm:$0xff]  ;;  %s81_s1 = smov [#allocation2]  }
   0x3   :  { %53 = vset.pattern.permute.xlu0 %v80_v1  ;;  %v15_v4 = vld [vmem:[%s117_s0] sm:$0xff]  ;;  %s40_s20 = sshll.u32 %s81_s1, 4  ;;  %s42_s23 = sshll.u32 %s120_s3, 4  ;;  %s41_s20 = int_to_ptr.vmem [resolvable:$true] %s40_s20  ;;  %s43_s23 = int_to_ptr.hbm [resolvable:$true] %s42_s23 }
   0x4   :  { %20 = vperm.xlu0 %53, %v17_v0  }
   0xc   :  { %28 = vperm.xlu0 %53, %v25_v2  }
  0x76   :  { %v21_v3 = vpop.permute.xlu0 %20 }
  0x77   :  { %v23_v6 = vmul.f32 %v21_v3, %v15_v4  ;;  %v24_v7 = vmul.f32 %v21_v3, %v16_v5 }
  0x7e   :  { %v29_v8 = vpop.permute.xlu0 %28 }
  0x7f   :  { %v31_v9 = vadd.f32 %v29_v8, %v23_v6  ;;  %v32_v10 = vadd.f32 %v29_v8, %v24_v7 }
  0x81   :  { %33 = vst [vmem:[#allocation2] sm:$0xff] %v31_v9 }
  0x82   :  { %34 = vst [vmem:[#allocation2 + $0x8] sm:$0xff] %v32_v10 }
  0x83   :  { %45 = dma.vmem_to_hbm [thread:$0]  %s41_s20, 256, %s43_s23, [#allocation3]  }
  0x84   :  { %78 = dma.done.wait [#allocation3], 256  }
  0x85   :  { %79 = vsyncadd [#allocation3], 4294967040 }
  0x86   :  { %50 = vsyncpa [#allocation3], 1 }

</bundles_post_ra>
